<compile_context>
chip_gen: v7x
topology: tpu7x:2x2x1
jax: 0.10.0
libtpu: 0.0.40
codegen_flags: <defaults>
</compile_context>

<pallas_src>
import functools
import math

import jax
import jax.numpy as jnp
from jax.experimental import pallas as pl
from jax.experimental.pallas import tpu as pltpu


def _round_up(x, m):
    return ((x + m - 1) // m) * m


def _scale_kernel(g_ref, o_ref, *, scale):
    # backward: grad_input = grad_output * scale_factor
    o_ref[...] = g_ref[...] * scale


def _vmem_budget():
    """Generation-aware (tile_bytes_per_buffer, vmem_limit_bytes)."""
    try:
        cap = getattr(pltpu.get_tpu_info(), "vmem_capacity_bytes", None)
    except Exception:
        cap = None
    if cap is not None and cap >= (128 << 20):
        # v5e / v6e: 128 MiB physical VMEM -> larger tiles; raise the scoped
        # limit (v5e's default scoped limit is only 16 MiB).
        return 8 << 20, 64 << 20
    # v7x (64 MiB physical) or unknown: 4 buffers x 4 MiB = 16 MiB, well under
    # a 32 MiB scoped limit; never request the full physical VMEM.
    return 4 << 20, 32 << 20


def _scale_2d(g2d, scale):
    """Run the tiled scale kernel over a (rows, lanes) slab (lanes % 128 == 0)."""
    rows, lanes = g2d.shape
    itemsize = jnp.dtype(g2d.dtype).itemsize
    sublane = max(8, 32 // itemsize)          # 8 f32, 16 bf16, 32 int8/fp8
    tile_bytes, vmem_limit = _vmem_budget()

    max_tile_rows = max(
        sublane, (tile_bytes // (lanes * itemsize)) // sublane * sublane
    )
    # Aim for >= 4 grid steps so the "parallel" axis can shard across v7x's
    # two TensorCores (harmless on the 1-TC v5e/v6e).
    target_rows = _round_up(pl.cdiv(rows, 4), sublane)
    row_tile = min(max_tile_rows, target_rows)
    if row_tile >= rows:
        row_tile = rows                       # full-extent block (always legal)

    grid = (pl.cdiv(rows, row_tile),)         # partial last block masked by Pallas

    kernel = functools.partial(_scale_kernel, scale=scale)
    return pl.pallas_call(
        kernel,
        out_shape=jax.ShapeDtypeStruct((rows, lanes), g2d.dtype),
        grid_spec=pl.GridSpec(
            grid=grid,
            in_specs=[pl.BlockSpec((row_tile, lanes), lambda i: (i, 0))],
            out_specs=pl.BlockSpec((row_tile, lanes), lambda i: (i, 0)),
        ),
        compiler_params=pltpu.CompilerParams(
            dimension_semantics=("parallel",),
            vmem_limit_bytes=vmem_limit,
        ),
    )(g2d)


def _backward_pallas(g, scale_factor):
    orig_shape = g.shape
    total = math.prod(orig_shape) if orig_shape else 1
    scale = float(scale_factor)

    if total == 0:
        return g

    # Aligned fast path: no out-of-kernel pad / slice, no extra HBM passes.
    lanes = None
    for cand in (512, 256, 128):
        if total % cand == 0:
            lanes = cand
            break
    if lanes is not None:
        out2d = _scale_2d(g.reshape(total // lanes, lanes), scale)
        return out2d.reshape(orig_shape)

    # Ragged fallback (numel not a multiple of 128): minimal pad to one
    # 128-lane row multiple, then slice back.
    # TODO(synk): rare path; keeps in-kernel stores lane-dense at the cost of
    # one extra pad/slice pass outside the kernel.
    lanes = 128
    rows = pl.cdiv(total, lanes)
    padded = rows * lanes
    g_flat = jnp.pad(g.reshape(-1), (0, padded - total))
    out2d = _scale_2d(g_flat.reshape(rows, lanes), scale)
    return out2d.reshape(-1)[:total].reshape(orig_shape)


@functools.partial(jax.custom_vjp, nondiff_argnums=(1,))
def normalisation_pooling(x, scale_factor):
    """Matches normalisation_pooling.forward(input, scale_factor)."""
    # Forward is `input * 1` -> pure identity, deliberately no Pallas kernel.
    return x


def _np_fwd(x, scale_factor):
    return x, None


def _np_bwd(scale_factor, _res, g):
    # PyTorch backward: grad_input = grad_output * scale_factor (Pallas kernel).
    return (_backward_pallas(g, scale_factor),)


normalisation_pooling.defvjp(_np_fwd, _np_bwd)


if __name__ == "__main__":
    key = jax.random.PRNGKey(0)
    x = jax.random.normal(key, (2, 4, 16, 16), dtype=jnp.float32)
    scale_factor = 0.5

    # Forward pass (identity, no kernel launch).
    y = jax.block_until_ready(normalisation_pooling(x, scale_factor))
    assert y.shape == x.shape and y.dtype == x.dtype
    assert jnp.allclose(y, x), "forward must be identity (input * 1)"

    # Backward pass runs the tiled Pallas scale kernel (aligned fast path:
    # 2048 elements -> (4, 512) slab, no pad/slice).
    grad = jax.grad(lambda a: jnp.sum(normalisation_pooling(a, scale_factor)))(x)
    grad = jax.block_until_ready(grad)
    assert grad.shape == x.shape and grad.dtype == x.dtype
    assert jnp.allclose(grad, jnp.full_like(x, scale_factor)), "backward scale mismatch"

    # Ragged (non-128-multiple) shape exercises the minimal pad/slice fallback
    # and a multi-step masked grid.
    g_big = jax.random.normal(jax.random.PRNGKey(1), (3, 5, 17, 19), jnp.float32)
    gi_big = jax.block_until_ready(_backward_pallas(g_big, scale_factor))
    assert jnp.allclose(gi_big, g_big * scale_factor)

    # bf16 gradient exercises the dtype-aware sublane rounding; result stays bf16.
    g_bf = jax.random.normal(jax.random.PRNGKey(2), (2, 4, 16, 16)).astype(jnp.bfloat16)
    gi_bf = jax.block_until_ready(_backward_pallas(g_bf, scale_factor))
    assert gi_bf.dtype == jnp.bfloat16
    assert jnp.allclose(gi_bf.astype(jnp.float32),
                        (g_bf * scale_factor).astype(jnp.float32))

    print("KERNEL_OK")
</pallas_src>

<mosaic_0001>
module attributes {stable_mosaic.version = 11 : i64} {
  func.func @_scale_kernel(%arg0: i32, %arg1: memref<4x512xf32, #tpu.memory_space<vmem>>, %arg2: memref<4x512xf32, #tpu.memory_space<vmem>>) attributes {dimension_semantics = [#tpu.dimension_semantics<parallel>], iteration_bounds = array<i64: 1>, scalar_prefetch = 0 : i64, scratch_operands = 0 : i64, tpu.core_type = #tpu.core_type<tc>, window_params = [{transform_indices = @transform_0, window_bounds = array<i64: 4, 512>}, {transform_indices = @transform_1, window_bounds = array<i64: 4, 512>}]} {
    %c0 = arith.constant 0 : index
    %c0_0 = arith.constant 0 : index
    %0 = vector.load %arg1[%c0, %c0_0] : memref<4x512xf32, #tpu.memory_space<vmem>>, vector<4x512xf32>
    %cst = arith.constant 5.000000e-01 : f32
    %1 = vector.broadcast %cst : f32 to vector<4x512xf32>
    %2 = arith.mulf %0, %1 : vector<4x512xf32>
    %c0_1 = arith.constant 0 : index
    %c0_2 = arith.constant 0 : index
    %3 = vector.load %arg2[%c0_1, %c0_2] : memref<4x512xf32, #tpu.memory_space<vmem>>, vector<4x512xf32>
    tpu.vector_store %arg2[%c0_1, %c0_2], %2 {strides = array<i32>} : memref<4x512xf32, #tpu.memory_space<vmem>>, vector<4x512xf32>,
    return
  }
  func.func @transform_0(%arg0: i32) -> (i32, i32) {
    %c0_i32 = arith.constant 0 : i32
    %c0_i32_0 = arith.constant 0 : i32
    return %arg0, %c0_i32 : i32, i32
  }
  func.func @transform_1(%arg0: i32) -> (i32, i32) {
    %c0_i32 = arith.constant 0 : i32
    %c0_i32_0 = arith.constant 0 : i32
    return %arg0, %c0_i32 : i32, i32
  }
}

</mosaic_0001>

<bundles_post_ra>
// kernel: tpu_custom_call.1
= control target key start
LH: loop header
LB: loop body
LE: loop exit
PB: predicated region body
PF: predicated region fallthrough
CT: control target
= control target key end

     0   :  { %6 = vsyncpa [#allocation3], 0  ;;  %s128_s0 = inlined_call_operand.hbm [shape: f32[4,512], index: 0, kind: input, shape index: {}]   ;;  %s129_s1 = inlined_call_operand.hbm [shape: f32[4,512], index: 1, kind: output, shape index: {}]  }
   0x1   :  { %7 = vsyncpa [#allocation4], 0  ;;  %s92_s6 = smov [#allocation2]   ;;  %s44_s10 = scalar_lea.hbm %s128_s0, 256 }
   0x2   :  { %s14_s7 = sshll.u32 %s92_s6, 4  ;;  %p45_p0 = scmp.ne.s32.totalorder %s128_s0, %s44_s10  ;;  %s15_s7 = int_to_ptr.vmem [resolvable:$true] %s14_s7 }
   0x3   :  { %p48_p1 = scmp.lt.u32.totalorder %s44_s10, %s128_s0 }
   0x5   :  { %p50_p2 = pnand %p48_p1, %p45_p0 }
   0x7   :  { %53 = shalt.err (!%p50_p2)
}
   0x8   :  { %s54_s15 = scalar_lea.vmem %s15_s7, 256  ;;  %p59_p4 = scmp.lt.s32.totalorder %s15_s7, %s15_s7 }
   0x9   :  { %p55_p3 = scmp.ne.s32.totalorder %s15_s7, %s54_s15  ;;  %p60_p5 = scmp.lt.s32.totalorder %s54_s15, %s54_s15 }
   0xb   :  { %p61_p6 = por %p60_p5, %p59_p4 }
   0xd   :  { %p62_p7 = pnand %p61_p6, %p55_p3 }
   0xf   :  { %65 = shalt.err (!%p62_p7)
}
  0x10   :  { %17 = dma.hbm_to_vmem [thread:$0]  %s128_s0, 256, %s15_s7, [#allocation3]  }
  0x11   :  { %88 = dma.done.wait [#allocation3], 256  }
  0x12   :  { %89 = vsyncadd [#allocation3], 4294967040  ;;  %s93_s18 = smov [#allocation5]   ;;  %v21_v0 = vld [vmem:[#allocation2] sm:$0xff]  ;;  %v22_v1 = vld [vmem:[#allocation2 + $0x8] sm:$0xff] }
  0x13   :  { %s33_s19 = sshll.u32 %s93_s18, 4  ;;  %v23_v2 = vmul.f32 0.5, %v21_v0  ;;  %v24_v3 = vmul.f32 0.5, %v22_v1  ;;  %s34_s19 = int_to_ptr.vmem [resolvable:$true] %s33_s19 }
  0x14   :  { %s66_s20 = scalar_lea.vmem %s34_s19, 256  ;;  %p71_p9 = scmp.lt.s32.totalorder %s34_s19, %s34_s19 }
  0x15   :  { %25 = vst [vmem:[#allocation5] sm:$0xff] %v23_v2  ;;  %26 = vst [vmem:[#allocation5 + $0x8] sm:$0xff] %v24_v3  ;;  %p67_p8 = scmp.ne.s32.totalorder %s34_s19, %s66_s20  ;;  %p72_p10 = scmp.lt.s32.totalorder %s66_s20, %s66_s20 }
  0x17   :  { %p73_p11 = por %p72_p10, %p71_p9 }
  0x19   :  { %p74_p12 = pnand %p73_p11, %p67_p8 }
  0x1b   :  { %77 = shalt.err (!%p74_p12)
}
  0x1c   :  { %s78_s22 = scalar_lea.hbm %s129_s1, 256 }
  0x1d   :  { %p79_p13 = scmp.ne.s32.totalorder %s129_s1, %s78_s22  ;;  %p82_p0 = scmp.lt.u32.totalorder %s78_s22, %s129_s1 }
  0x1f   :  { %p84_p1 = pnand %p82_p0, %p79_p13 }
  0x21   :  { %87 = shalt.err (!%p84_p1)
}
  0x22   :  { %36 = dma.vmem_to_hbm [thread:$0]  %s34_s19, 256, %s129_s1, [#allocation4]  }
  0x23   :  { %90 = dma.done.wait [#allocation4], 256  }
  0x24   :  { %91 = vsyncadd [#allocation4], 4294967040 }
  0x25   :  { %40 = vsyncpa [#allocation3], 1 }
  0x26   :  { %41 = vsyncpa [#allocation4], 1 }

</bundles_post_ra>
